<compile_context>
chip_gen: v6e
topology: v6e:2x2x1
jax: 0.10.0
libtpu: 0.0.40
codegen_flags: <defaults>
</compile_context>

<pallas_src>
import functools
import math

import jax
import jax.numpy as jnp
from jax.experimental import pallas as pl
from jax.experimental.pallas import tpu as pltpu

_MAX_BLOCK_ROWS = 8192


def _round_up(x: int, m: int) -> int:
    return ((x + m - 1) // m) * m


def _sublane_multiple(dtype) -> int:
    # f32 -> 8, bf16/f16 -> 16, int8/fp8 -> 32 (sub-32-bit dtypes pack along sublanes).
    itemsize = jnp.dtype(dtype).itemsize
    return max(8, 8 * (4 // max(itemsize, 1)))


def _vmem_budgets() -> tuple[int, int]:
    """Returns (tile working-set budget, scoped vmem limit) in bytes, per chip generation."""
    cap = None
    try:
        cap = getattr(pltpu.get_tpu_info(), "vmem_capacity_bytes", None)
    except Exception:
        cap = None
    if cap is None:
        cap = 64 * 1024 * 1024            # conservative default (v7x-sized)
    if cap >= 96 * 1024 * 1024:           # v5e / v6e: 128 MiB physical VMEM
        return 64 * 1024 * 1024, 96 * 1024 * 1024
    return 32 * 1024 * 1024, 48 * 1024 * 1024   # v7x: 64 MiB per TensorCore


def _rmsnorm_kernel(x_ref, o_ref, *, inv_n: float, eps: float):
    # x_ref / o_ref: (block_rows, dim) VMEM tiles.  Accumulate in f32 and reuse
    # the cast for the output multiply (single load, single convert per element).
    xf = x_ref[...].astype(jnp.float32)
    sumsq = jnp.sum(xf * xf, axis=-1, keepdims=True)
    inv_rms = jax.lax.rsqrt(sumsq * inv_n + eps)           # rsqrt -> EUP slot (cheap)
    o_ref[...] = (xf * inv_rms).astype(o_ref.dtype)


@functools.partial(jax.jit, static_argnames=("eps", "block_rows"))
def rms_norm(x: jax.Array, eps: float | None = None, block_rows: int | None = None) -> jax.Array:
    """RMS-normalise `x` along its last axis (matches torch rms_norm(x, dim=-1), no weight)."""
    if not jnp.issubdtype(x.dtype, jnp.floating):
        raise TypeError(f"rms_norm expects a floating dtype, got {x.dtype}")

    orig_shape = x.shape
    dim = orig_shape[-1]
    rows = math.prod(orig_shape[:-1]) if len(orig_shape) > 1 else 1

    if eps is None:
        # torch.nn.functional.rms_norm default: eps = finfo(input.dtype).eps
        eps = float(jnp.finfo(x.dtype).eps)

    itemsize = jnp.dtype(x.dtype).itemsize
    sub = _sublane_multiple(x.dtype)
    tile_budget, vmem_limit = _vmem_budgets()

    # Pick the largest sublane-aligned row tile that fits the VMEM budget.
    if block_rows is None:
        # per row: in + out tiles, double-buffered (4 * itemsize) + f32 temps (~8 B/elem).
        per_row_bytes = dim * (4 * itemsize + 8)
        br = max(tile_budget // per_row_bytes, sub)
        br = min(br, _MAX_BLOCK_ROWS)
        br = max((br // sub) * sub, sub)
    else:
        br = max(_round_up(int(block_rows), sub), sub)
    if br >= rows:
        # One block covering the whole row extent (block dim == full array dim is legal).
        br = rows
    block_rows = int(br)

    x2d = x.reshape(rows, dim)
    grid = (pl.cdiv(rows, block_rows),)   # ragged last block handled by Pallas masked writeback

    kernel = functools.partial(_rmsnorm_kernel, inv_n=1.0 / float(dim), eps=float(eps))

    cost = pl.CostEstimate(
        flops=3 * rows * dim,                      # square + reduce-add + final multiply
        transcendentals=rows,                      # one rsqrt per row
        bytes_accessed=2 * rows * dim * itemsize,  # true traffic: 1 read + 1 write
    )

    out = pl.pallas_call(
        kernel,
        out_shape=jax.ShapeDtypeStruct((rows, dim), x.dtype),
        grid_spec=pltpu.PrefetchScalarGridSpec(
            num_scalar_prefetch=0,
            grid=grid,
            in_specs=[pl.BlockSpec((block_rows, dim), lambda i: (i, 0))],
            out_specs=pl.BlockSpec((block_rows, dim), lambda i: (i, 0)),
        ),
        compiler_params=pltpu.CompilerParams(
            # Row blocks are independent: lets the runtime shard the grid across
            # both TensorCores on v7x; no-op on single-TC v5e/v6e.
            dimension_semantics=("parallel",),
            vmem_limit_bytes=vmem_limit,
        ),
        cost_estimate=cost,
    )(x2d)

    return out.reshape(orig_shape)


def _reference_rms_norm(x: jax.Array, eps: float) -> jax.Array:
    xf = x.astype(jnp.float32)
    ms = jnp.mean(xf * xf, axis=-1, keepdims=True)
    return (xf * jax.lax.rsqrt(ms + eps)).astype(x.dtype)


if __name__ == "__main__":
    key = jax.random.PRNGKey(0)
    # Small example consistent with the module: (batch=2, seq=8, hidden=32).
    x = jax.random.normal(key, (2, 8, 32), dtype=jnp.float32)

    y = jax.block_until_ready(rms_norm(x))
    eps = float(jnp.finfo(x.dtype).eps)
    y_ref = _reference_rms_norm(x, eps)
    assert y.shape == x.shape and y.dtype == x.dtype
    assert jnp.allclose(y, y_ref, atol=1e-5, rtol=1e-5)

    # Ragged rows (15) + non-multiple-of-128 dim (100): no host-side padding,
    # single partial block on the row axis, full-extent lane block.
    x2 = jax.random.normal(jax.random.PRNGKey(1), (3, 5, 100), dtype=jnp.float32)
    y2 = jax.block_until_ready(rms_norm(x2))
    assert jnp.allclose(y2, _reference_rms_norm(x2, eps), atol=1e-5, rtol=1e-5)

    # bf16 with a forced small row tile -> multi-step grid with a ragged last block.
    x3 = jax.random.normal(jax.random.PRNGKey(2), (5, 9, 64), dtype=jnp.bfloat16)
    y3 = jax.block_until_ready(rms_norm(x3, block_rows=16))
    y3_ref = _reference_rms_norm(x3, float(jnp.finfo(jnp.bfloat16).eps))
    assert y3.dtype == x3.dtype
    assert jnp.allclose(y3.astype(jnp.float32), y3_ref.astype(jnp.float32), atol=2e-2, rtol=2e-2)

    print("KERNEL_OK")
</pallas_src>

<mosaic_0001>
module attributes {stable_mosaic.version = 11 : i64} {
  func.func @_rmsnorm_kernel(%arg0: i32, %arg1: memref<16x32xf32, #tpu.memory_space<vmem>>, %arg2: memref<16x32xf32, #tpu.memory_space<vmem>>) attributes {dimension_semantics = [#tpu.dimension_semantics<parallel>], iteration_bounds = array<i64: 1>, scalar_prefetch = 0 : i64, scratch_operands = 0 : i64, tpu.core_type = #tpu.core_type<tc>, window_params = [{transform_indices = @transform_0, window_bounds = array<i64: 16, 32>}, {transform_indices = @transform_1, window_bounds = array<i64: 16, 32>}]} {
    %c0 = arith.constant 0 : index
    %c0_0 = arith.constant 0 : index
    %0 = vector.load %arg1[%c0, %c0_0] : memref<16x32xf32, #tpu.memory_space<vmem>>, vector<16x32xf32>
    %1 = arith.mulf %0, %0 : vector<16x32xf32>
    %cst = arith.constant dense<0.000000e+00> : vector<16xf32>
    %2 = vector.multi_reduction <add>, %1, %cst [1] : vector<16x32xf32> to vector<16xf32>
    %3 = vector.shape_cast %2 : vector<16xf32> to vector<16x1xf32>
    %cst_1 = arith.constant 3.125000e-02 : f32
    %4 = vector.broadcast %cst_1 : f32 to vector<16x1xf32>
    %5 = arith.mulf %3, %4 : vector<16x1xf32>
    %cst_2 = arith.constant 1.1920929E-7 : f32
    %6 = vector.broadcast %cst_2 : f32 to vector<16x1xf32>
    %7 = arith.addf %5, %6 : vector<16x1xf32>
    %8 = math.rsqrt %7 : vector<16x1xf32>
    %9 = vector.broadcast %8 : vector<16x1xf32> to vector<16x32xf32>
    %10 = arith.mulf %0, %9 : vector<16x32xf32>
    %c0_3 = arith.constant 0 : index
    %c0_4 = arith.constant 0 : index
    %11 = vector.load %arg2[%c0_3, %c0_4] : memref<16x32xf32, #tpu.memory_space<vmem>>, vector<16x32xf32>
    tpu.vector_store %arg2[%c0_3, %c0_4], %10 {strides = array<i32>} : memref<16x32xf32, #tpu.memory_space<vmem>>, vector<16x32xf32>,
    return
  }
  func.func @transform_0(%arg0: i32) -> (i32, i32) {
    %c0_i32 = arith.constant 0 : i32
    %c0_i32_0 = arith.constant 0 : i32
    return %arg0, %c0_i32 : i32, i32
  }
  func.func @transform_1(%arg0: i32) -> (i32, i32) {
    %c0_i32 = arith.constant 0 : i32
    %c0_i32_0 = arith.constant 0 : i32
    return %arg0, %c0_i32 : i32, i32
  }
}

</mosaic_0001>

<bundles_post_ra>
// kernel: rms_norm.1
= control target key start
LH: loop header
LB: loop body
LE: loop exit
PB: predicated region body
PF: predicated region fallthrough
CT: control target
= control target key end

     0   :  { %6 = vsyncpa [#allocation3], 0  ;;  %s143_s0 = inlined_call_operand.hbm [shape: f32[16,32], index: 0, kind: input, shape index: {}]   ;;  %s144_s1 = inlined_call_operand.hbm [shape: f32[16,32], index: 1, kind: output, shape index: {}]  }
   0x1   :  { %7 = vsyncpa [#allocation4], 0  ;;  %s113_s6 = smov [#allocation2]  }
   0x2   :  { %s13_s7 = sshll.u32 %s113_s6, 4  ;;  %s14_s7 = int_to_ptr.vmem [resolvable:$true] %s13_s7 }
   0x3   :  { %s77_s8 = scalar_lea.vmem %s14_s7, 256  ;;  %p82_p1 = scmp.lt.s32.totalorder %s14_s7, %s14_s7 }
   0x4   :  { %p78_p0 = scmp.ne.s32.totalorder %s14_s7, %s77_s8  ;;  %p83_p2 = scmp.lt.s32.totalorder %s77_s8, %s77_s8 }
   0x6   :  { %p84_p3 = por %p83_p2, %p82_p1 }
   0x8   :  { %p85_p4 = pnand %p84_p3, %p78_p0 }
   0xa   :  { %88 = shalt.err (!%p85_p4)
}
   0xb   :  { %s114_s9 = smov 128   ;;  %s115_s10 = smov 8  }
   0xc   :  { %19 = dma.hbm_to_vmem [thread:$0]  %s143_s0, 256, %s14_s7, [#allocation3], %s114_s9, %s114_s9, %s115_s10  }
   0xd   :  { %109 = dma.done.wait [#allocation3], 256  }
   0xe   :  { %110 = vsyncadd [#allocation3], 4294967040  ;;  %v23_v0 = vld [vmem:[#allocation2] sm:$0xff]  ;;  %vm27_vm0 = vcmask 261120   ;;  %v24_v1 = vld [vmem:[#allocation2 + $0x8] sm:$0xff]  ;;  %s116_s0 = smov [#allocation5]  }
   0xf   :  { %v25_v2 = vmul.f32 %v23_v0, %v23_v0  ;;  %v26_v3 = vmul.f32 %v24_v1, %v24_v1  ;;  %s49_s13 = sshll.u32 %s116_s0, 4  ;;  %s50_s13 = int_to_ptr.vmem [resolvable:$true] %s49_s13 }
  0x10   :  { %s89_s14 = scalar_lea.vmem %s50_s13, 256  ;;  %p94_p6 = scmp.lt.s32.totalorder %s50_s13, %s50_s13 }
  0x11   :  { %v28_v4 = vsel %vm27_vm0, %v25_v2, 0.0  ;;  %v31_v5 = vsel %vm27_vm0, %v26_v3, 0.0  ;;  %p90_p5 = scmp.ne.s32.totalorder %s50_s13, %s89_s14  ;;  %p95_p7 = scmp.lt.s32.totalorder %s89_s14, %s89_s14 }
  0x12   :  { %29 = vadd.xlane.f32.xlu0 %v28_v4 }
  0x13   :  { %p96_p8 = por %p95_p7, %p94_p6 }
  0x15   :  { %p97_p9 = pnand %p96_p8, %p90_p5 }
  0x16   :  { %32 = vadd.xlane.f32.xlu0 %v31_v5 }
  0x9b   :  { %v30_v6 = vpop.xlane.xlu0 %29 }
  0x9c   :  { %v34_v7 = vmul.f32 0.03125, %v30_v6 }
  0x9e   :  { %v36_v8 = vadd.f32 1.1920929e-07, %v34_v7 }
  0x9f   :  { %v33_v9 = vpop.xlane.xlu0 %32 }
  0xa0   :  { %65 = vrsqrt.f32 %v36_v8  ;;  %v35_v10 = vmul.f32 0.03125, %v33_v9 }
  0xa2   :  { %v37_v11 = vadd.f32 1.1920929e-07, %v35_v10 }
  0xa4   :  { %67 = vrsqrt.f32 %v37_v11 }
  0xad   :  { %v66_v12 = vpop.eup %65 }
  0xae   :  { %v40_v13 = vmul.f32 %v66_v12, %v23_v0 }
  0xb0   :  { %42 = vst.msk [vmem:[#allocation5] sm:$0xff] %vm27_vm0, %v40_v13 }
  0xb1   :  { %v68_v14 = vpop.eup %67 }
  0xb2   :  { %v41_v15 = vmul.f32 %v68_v14, %v24_v1 }
  0xb4   :  { %43 = vst.msk [vmem:[#allocation5 + $0x8] sm:$0xff] %vm27_vm0, %v41_v15 }
  0xb5   :  { %100 = shalt.err (!%p97_p9)
}
  0xb6   :  { %55 = dma.vmem_to_hbm [thread:$0]  %s50_s13, 256, %s144_s1, [#allocation4], %s114_s9, %s114_s9, %s115_s10  }
  0xb7   :  { %111 = dma.done.wait [#allocation4], 256  }
  0xb8   :  { %112 = vsyncadd [#allocation4], 4294967040 }
  0xb9   :  { %59 = vsyncpa [#allocation3], 1 }
  0xba   :  { %60 = vsyncpa [#allocation4], 1 }

</bundles_post_ra>
